<compile_context>
chip_gen: v5e
topology: v5e:2x2
jax: 0.10.0
libtpu: 0.0.40
codegen_flags: <defaults>
</compile_context>

<pallas_src>
import jax
import jax.numpy as jnp
from jax.experimental import pallas as pl
from jax.experimental.pallas import tpu as pltpu

EPS = 1e-5


def _round_up(v, m):
    return (v + m - 1) // m * m


def _vmem_caps():
    """Returns (working-set budget, vmem_limit_bytes) for this TPU generation."""
    try:
        phys = pltpu.get_tpu_info().vmem_capacity_bytes
    except Exception:  # no hardware info available -> assume smallest (v7x) VMEM
        phys = 64 * 1024 * 1024
    if phys >= 128 * 1024 * 1024:          # v5e / v6e: 128 MiB physical
        return 48 * 1024 * 1024, 64 * 1024 * 1024
    return 28 * 1024 * 1024, 48 * 1024 * 1024   # v7x: 64 MiB physical per TC


# --------------------- single-sweep kernel (full batch resident) -------------


def _bn_onepass_kernel(x_ref, gb_ref, out_ref):
    x = x_ref[...].astype(jnp.float32)                  # (N, TH)
    inv_n = 1.0 / x.shape[0]
    mean = jnp.sum(x, axis=0, keepdims=True) * inv_n    # (1, TH)
    centered = x - mean
    # Two-pass variance (numerically stable); tile is resident in VMEM so the
    # extra sweep is free in this HBM-bound kernel.
    var = jnp.sum(centered * centered, axis=0, keepdims=True) * inv_n
    inv_std = jax.lax.rsqrt(var + EPS)                   # (1, TH)
    gamma = gb_ref[0:1, :].astype(jnp.float32)
    beta = gb_ref[1:2, :].astype(jnp.float32)
    out_ref[...] = (centered * (gamma * inv_std) + beta).astype(out_ref.dtype)


# --------------------- two-phase kernels (large-N fallback) ------------------


def _bn_stats_kernel(x_ref, stats_ref):
    @pl.when(pl.program_id(1) == 0)
    def _():
        stats_ref[...] = jnp.zeros_like(stats_ref)

    xf = x_ref[...].astype(jnp.float32)                  # (TN, TH)
    stats_ref[0:1, :] += jnp.sum(xf, axis=0, keepdims=True)
    stats_ref[1:2, :] += jnp.sum(xf * xf, axis=0, keepdims=True)


def _make_bn_normalize_kernel(n_true):
    inv_n = 1.0 / n_true

    def kernel(x_ref, stats_ref, gb_ref, out_ref):
        s = stats_ref[...]                               # (2, TH) f32
        mean = s[0:1, :] * inv_n
        var = jnp.maximum(s[1:2, :] * inv_n - mean * mean, 0.0)
        inv_std = jax.lax.rsqrt(var + EPS)
        scale = gb_ref[0:1, :].astype(jnp.float32) * inv_std
        shift = gb_ref[1:2, :].astype(jnp.float32) - mean * scale
        out_ref[...] = (x_ref[...].astype(jnp.float32) * scale
                        + shift).astype(out_ref.dtype)

    return kernel


# --------------------- wrapper ----------------------------------------------


def batch_normalization(x, gamma, beta):
    """Training-mode batch norm over dim 0 of a (N, H) input."""
    n, h = x.shape
    itemsize = x.dtype.itemsize
    ws_budget, vmem_limit = _vmem_caps()

    hp128 = _round_up(h, 128)                  # lane-dense feature extent

    # gamma/beta packed into one (2, H) operand -> a single small DMA per step.
    gb = jnp.stack([gamma, beta], axis=0)

    # Tile sizing: bytes first, dtype-aware.  Per-lane working set of the
    # one-pass kernel: 2x double-buffered input + 2x output tile (+ ~2 f32
    # temporaries for the in-register math).
    per_lane_bytes = n * (4 * itemsize + 8)
    per_buf_target = 4 * 1024 * 1024           # ~4 MiB/buffer: past the roofline knee
    th = min(per_buf_target // max(n * itemsize, 1),
             ws_budget // max(per_lane_bytes, 1)) // 128 * 128

    if th >= 128:
        # ------------- single-sweep path (full batch fits in VMEM) ---------
        th = min(th, hp128)
        hp = _round_up(hp128, th)
        # v7x: ensure >= 2 grid steps so both TensorCores get work, but only
        # when each half-tile is still big enough to amortize per-step
        # overhead.  Neutral on single-TC v5e/v6e.
        if (hp // th == 1 and hp128 >= 256
                and n * hp128 * itemsize >= 2 * 1024 * 1024):
            th = _round_up(hp128 // 2, 128)
            hp = _round_up(hp128, th)
        grid = hp // th

        xp = x if hp == h else jnp.pad(x, ((0, 0), (0, hp - h)))
        gbp = gb if hp == h else jnp.pad(gb, ((0, 0), (0, hp - h)))

        out = pl.pallas_call(
            _bn_onepass_kernel,
            out_shape=jax.ShapeDtypeStruct((n, hp), x.dtype),
            grid_spec=pl.GridSpec(
                grid=(grid,),
                in_specs=[
                    pl.BlockSpec((n, th), lambda i: (0, i)),   # x tile (full batch)
                    pl.BlockSpec((2, th), lambda i: (0, i)),   # packed gamma/beta
                ],
                out_specs=pl.BlockSpec((n, th), lambda i: (0, i)),
            ),
            compiler_params=pltpu.CompilerParams(
                dimension_semantics=("parallel",),
                vmem_limit_bytes=vmem_limit,
            ),
            cost_estimate=pl.CostEstimate(
                flops=8 * n * hp,
                transcendentals=hp,
                bytes_accessed=2 * n * hp * itemsize + 4 * hp * itemsize,
            ),
        )(xp, gbp)
        return out[:, :h] if hp != h else out

    # ------------- two-phase fallback (N too large for one sweep) ----------
    th = min(512, hp128)
    hp = _round_up(hp128, th)
    per_row_bytes = th * (4 * itemsize + 8)
    tn = min(per_buf_target // max(th * itemsize, 1),
             ws_budget // max(per_row_bytes, 1)) // 8 * 8
    tn = max(8, min(tn, _round_up(n, 8)))
    n_pad = _round_up(n, tn)

    xp = jnp.pad(x, ((0, n_pad - n), (0, hp - h)))      # zero rows/lanes are inert
    gbp = gb if hp == h else jnp.pad(gb, ((0, 0), (0, hp - h)))
    grid = (hp // th, n_pad // tn)

    stats = pl.pallas_call(
        _bn_stats_kernel,
        out_shape=jax.ShapeDtypeStruct((2, hp), jnp.float32),
        grid_spec=pl.GridSpec(
            grid=grid,
            in_specs=[pl.BlockSpec((tn, th), lambda i, j: (j, i))],
            out_specs=pl.BlockSpec((2, th), lambda i, j: (0, i)),
        ),
        compiler_params=pltpu.CompilerParams(
            dimension_semantics=("parallel", "arbitrary"),
            vmem_limit_bytes=vmem_limit,
        ),
        cost_estimate=pl.CostEstimate(
            flops=3 * n_pad * hp,
            transcendentals=0,
            bytes_accessed=n_pad * hp * itemsize + 2 * hp * 4,
        ),
    )(xp)

    out = pl.pallas_call(
        _make_bn_normalize_kernel(n),
        out_shape=jax.ShapeDtypeStruct((n_pad, hp), x.dtype),
        grid_spec=pl.GridSpec(
            grid=grid,
            in_specs=[
                pl.BlockSpec((tn, th), lambda i, j: (j, i)),
                pl.BlockSpec((2, th), lambda i, j: (0, i)),
                pl.BlockSpec((2, th), lambda i, j: (0, i)),
            ],
            out_specs=pl.BlockSpec((tn, th), lambda i, j: (j, i)),
        ),
        compiler_params=pltpu.CompilerParams(
            dimension_semantics=("parallel", "parallel"),
            vmem_limit_bytes=vmem_limit,
        ),
        cost_estimate=pl.CostEstimate(
            flops=4 * n_pad * hp,
            transcendentals=hp,
            bytes_accessed=2 * n_pad * hp * itemsize + 6 * hp * 4,
        ),
    )(xp, stats, gbp)

    return out[:n, :h]


def _reference(x, gamma, beta):
    mean = jnp.mean(x, axis=0, keepdims=True)
    var = jnp.mean((x - mean) ** 2, axis=0, keepdims=True)
    return gamma * ((x - mean) / jnp.sqrt(var + EPS)) + beta


if __name__ == "__main__":
    key = jax.random.PRNGKey(0)
    N, H = 8, 32                          # batch=8, hidden_dim=32

    x = jax.random.normal(key, (N, H), dtype=jnp.float32)
    gamma = jnp.ones((H,), dtype=jnp.float32)   # nn.Parameter(torch.ones(hidden_dim))
    beta = jnp.zeros((H,), dtype=jnp.float32)   # nn.Parameter(torch.zeros(hidden_dim))

    out = batch_normalization(x, gamma, beta)
    out = jax.block_until_ready(out)

    ref = _reference(x, gamma, beta)
    assert out.shape == ref.shape, "shape mismatch vs reference"
    assert jnp.allclose(out, ref, atol=1e-5, rtol=1e-5), "mismatch vs reference"

    # Second tiny check exercising the lane-padding path (H not a multiple of 128).
    k2 = jax.random.PRNGKey(1)
    x2 = jax.random.normal(k2, (16, 200), dtype=jnp.float32) * 3.0 + 1.5
    g2 = jax.random.normal(jax.random.PRNGKey(2), (200,), dtype=jnp.float32)
    b2 = jax.random.normal(jax.random.PRNGKey(3), (200,), dtype=jnp.float32)
    out2 = jax.block_until_ready(batch_normalization(x2, g2, b2))
    ref2 = _reference(x2, g2, b2)
    assert jnp.allclose(out2, ref2, atol=1e-4, rtol=1e-4), "padded-path mismatch"

    print("KERNEL_OK")
</pallas_src>

<mosaic_0001>
module attributes {stable_mosaic.version = 11 : i64} {
  func.func @_bn_onepass_kernel(%arg0: i32, %arg1: memref<8x128xf32, #tpu.memory_space<vmem>>, %arg2: memref<2x128xf32, #tpu.memory_space<vmem>>, %arg3: memref<8x128xf32, #tpu.memory_space<vmem>>) attributes {dimension_semantics = [#tpu.dimension_semantics<parallel>], iteration_bounds = array<i64: 1>, scalar_prefetch = 0 : i64, scratch_operands = 0 : i64, tpu.core_type = #tpu.core_type<tc>, window_params = [{transform_indices = @transform_0, window_bounds = array<i64: 8, 128>}, {transform_indices = @transform_1, window_bounds = array<i64: 2, 128>}, {transform_indices = @transform_2, window_bounds = array<i64: 8, 128>}]} {
    %c0 = arith.constant 0 : index
    %c0_0 = arith.constant 0 : index
    %0 = vector.load %arg1[%c0, %c0_0] : memref<8x128xf32, #tpu.memory_space<vmem>>, vector<8x128xf32>
    %cst = arith.constant dense<0.000000e+00> : vector<128xf32>
    %1 = vector.multi_reduction <add>, %0, %cst [0] : vector<8x128xf32> to vector<128xf32>
    %2 = vector.shape_cast %1 : vector<128xf32> to vector<1x128xf32>
    %cst_1 = arith.constant 1.250000e-01 : f32
    %3 = vector.broadcast %cst_1 : f32 to vector<1x128xf32>
    %4 = arith.mulf %2, %3 : vector<1x128xf32>
    %5 = vector.broadcast %4 : vector<1x128xf32> to vector<8x128xf32>
    %6 = arith.subf %0, %5 : vector<8x128xf32>
    %7 = arith.mulf %6, %6 : vector<8x128xf32>
    %cst_2 = arith.constant dense<0.000000e+00> : vector<128xf32>
    %8 = vector.multi_reduction <add>, %7, %cst_2 [0] : vector<8x128xf32> to vector<128xf32>
    %9 = vector.shape_cast %8 : vector<128xf32> to vector<1x128xf32>
    %cst_3 = arith.constant 1.250000e-01 : f32
    %10 = vector.broadcast %cst_3 : f32 to vector<1x128xf32>
    %11 = arith.mulf %9, %10 : vector<1x128xf32>
    %cst_4 = arith.constant 9.99999974E-6 : f32
    %12 = vector.broadcast %cst_4 : f32 to vector<1x128xf32>
    %13 = arith.addf %11, %12 : vector<1x128xf32>
    %14 = math.rsqrt %13 : vector<1x128xf32>
    %c0_5 = arith.constant 0 : index
    %c0_6 = arith.constant 0 : index
    %15 = vector.load %arg2[%c0_5, %c0_6] : memref<2x128xf32, #tpu.memory_space<vmem>>, vector<1x128xf32>
    %c1 = arith.constant 1 : index
    %c0_7 = arith.constant 0 : index
    %16 = vector.load %arg2[%c1, %c0_7] : memref<2x128xf32, #tpu.memory_space<vmem>>, vector<1x128xf32>
    %17 = arith.mulf %15, %14 : vector<1x128xf32>
    %18 = vector.broadcast %17 : vector<1x128xf32> to vector<8x128xf32>
    %19 = arith.mulf %6, %18 : vector<8x128xf32>
    %20 = vector.broadcast %16 : vector<1x128xf32> to vector<8x128xf32>
    %21 = arith.addf %19, %20 : vector<8x128xf32>
    %c0_8 = arith.constant 0 : index
    %c0_9 = arith.constant 0 : index
    %22 = vector.load %arg3[%c0_8, %c0_9] : memref<8x128xf32, #tpu.memory_space<vmem>>, vector<8x128xf32>
    tpu.vector_store %arg3[%c0_8, %c0_9], %21 {strides = array<i32>} : memref<8x128xf32, #tpu.memory_space<vmem>>, vector<8x128xf32>,
    return
  }
  func.func @transform_0(%arg0: i32) -> (i32, i32) {
    %c0_i32 = arith.constant 0 : i32
    %c0_i32_0 = arith.constant 0 : i32
    return %c0_i32, %arg0 : i32, i32
  }
  func.func @transform_1(%arg0: i32) -> (i32, i32) {
    %c0_i32 = arith.constant 0 : i32
    %c0_i32_0 = arith.constant 0 : i32
    return %c0_i32, %arg0 : i32, i32
  }
  func.func @transform_2(%arg0: i32) -> (i32, i32) {
    %c0_i32 = arith.constant 0 : i32
    %c0_i32_0 = arith.constant 0 : i32
    return %c0_i32, %arg0 : i32, i32
  }
}

</mosaic_0001>

<bundles_post_ra>
// kernel: tpu_custom_call.1
= control target key start
LH: loop header
LB: loop body
LE: loop exit
PB: predicated region body
PF: predicated region fallthrough
CT: control target
= control target key end

     0   :  { %7 = vsyncpa [#allocation3], 0  ;;  %s205_s0 = inlined_call_operand.hbm [shape: f32[8,128], index: 0, kind: input, shape index: {}]   ;;  %s206_s1 = inlined_call_operand.hbm [shape: f32[2,128], index: 1, kind: input, shape index: {}]   ;;  %s207_s2 = inlined_call_operand.hbm [shape: f32[8,128], index: 2, kind: output, shape index: {}]  }
   0x1   :  { %8 = vsyncpa [#allocation6], 0 }
   0x2   :  { %9 = vsyncpa [#allocation4], 0  ;;  %s15_s11 = sshll.u32 %s205_s0, 4  ;;  %s178_s12 = smov [#allocation2]   ;;  %s16_s11 = int_to_ptr.hbm [resolvable:$true] %s15_s11 }
   0x3   :  { %s17_s13 = sshll.u32 %s178_s12, 4  ;;  %s26_s16 = sshll.u32 %s206_s1, 4  ;;  %s18_s13 = int_to_ptr.vmem [resolvable:$true] %s17_s13  ;;  %s27_s16 = int_to_ptr.hbm [resolvable:$true] %s26_s16 }
   0x4   :  { %20 = dma.hbm_to_vmem [thread:$0]  %s16_s11, 128, %s18_s13, [#allocation3]  }
   0x5   :  { %s179_s17 = smov [#allocation5]  }
   0x6   :  { %s28_s18 = sshll.u32 %s179_s17, 4  ;;  %s29_s18 = int_to_ptr.vmem [resolvable:$true] %s28_s18 }
   0x7   :  { %31 = dma.hbm_to_vmem [thread:$0]  %s27_s16, 32, %s29_s18, [#allocation6]  }
   0x8   :  { %172 = dma.done.wait [#allocation3], 128  }
   0x9   :  { %173 = vsyncadd [#allocation3], 4294967168 }
   0xa   :  { %174 = dma.done.wait [#allocation6], 32  }
   0xb   :  { %175 = vsyncadd [#allocation6], 4294967264  ;;  %v40_v0 = vld [vmem:[#allocation2] sm:$0xff]  ;;  %v68_v24 = vld [vmem:[#allocation5] sm:$0x1]  ;;  %s180_s0 = smov [#allocation7]  }
   0xc   :  { %v41_v1 = vrot.slane %v40_v0, 4  ;;  %v97_v28 = vld [vmem:[#allocation5 + $0x1] ss:$0 sm:$0xff]  ;;  %s81_s1 = sshll.u32 %s180_s0, 4  ;;  %s83_s21 = sshll.u32 %s207_s2, 4  ;;  %s82_s1 = int_to_ptr.vmem [resolvable:$true] %s81_s1  ;;  %s84_s21 = int_to_ptr.hbm [resolvable:$true] %s83_s21 }
   0xe   :  { %v42_v2 = vadd.f32 %v41_v1, %v40_v0 }
  0x10   :  { %v43_v3 = vrot.slane %v42_v2, 2 }
  0x12   :  { %v44_v4 = vadd.f32 %v43_v3, %v42_v2 }
  0x14   :  { %v45_v5 = vrot.slane %v44_v4, 1 }
  0x16   :  { %v46_v6 = vadd.f32 %v45_v5, %v44_v4 }
  0x18   :  { %v47_v7 = vmul.f32 0.125, %v46_v6 }
  0x1a   :  { %v48_v8 = vsub.f32 %v40_v0, %v47_v7 }
  0x1c   :  { %v49_v9 = vmul.f32 %v48_v8, %v48_v8 }
  0x1e   :  { %v50_v10 = vrot.slane %v49_v9, 4 }
  0x20   :  { %v51_v11 = vadd.f32 %v50_v10, %v49_v9 }
  0x22   :  { %v52_v12 = vrot.slane %v51_v11, 2 }
  0x24   :  { %v53_v13 = vadd.f32 %v52_v12, %v51_v11 }
  0x26   :  { %v54_v14 = vrot.slane %v53_v13, 1 }
  0x28   :  { %v55_v15 = vadd.f32 %v54_v14, %v53_v13 }
  0x2a   :  { %v56_v16 = vmul.f32 0.125, %v55_v15 }
  0x2c   :  { %v57_v17 = vadd.f32 1e-05, %v56_v16 }
  0x2e   :  { %98 = vrsqrt.f32 %v57_v17  ;;  %vm64_vm0 = vweird.f32 %v57_v17 }
  0x34   :  { %v99_v18 = vpop.eup %98 }
  0x35   :  { %v59_v19 = vmul.f32 %v99_v18, %v57_v17  ;;  %vm65_vm1 = vweird.f32 %v99_v18 }
  0x36   :  { %vm66_vm2 = vmor %vm64_vm0, %vm65_vm1 }
  0x37   :  { %v60_v20 = vmul.f32 %v99_v18, %v59_v19 }
  0x39   :  { %v61_v21 = vmul.f32 0.5, %v60_v20 }
  0x3b   :  { %v62_v22 = vsub.f32 1.5, %v61_v21 }
  0x3d   :  { %v63_v23 = vmul.f32 %v99_v18, %v62_v22 }
  0x3f   :  { %v67_v25 = vsel %vm66_vm2, %v99_v18, %v63_v23 }
  0x40   :  { %v70_v26 = vmul.f32 %v68_v24, %v67_v25 }
  0x42   :  { %v71_v27 = vperm.slane %v70_v26, 0 }
  0x44   :  { %v72_v29 = vmul.f32 %v71_v27, %v48_v8 }
  0x46   :  { %v74_v30 = vadd.f32 %v97_v28, %v72_v29 }
  0x48   :  { %75 = vst [vmem:[#allocation7] sm:$0xff] %v74_v30 }
  0x49   :  { %86 = dma.vmem_to_hbm [thread:$0]  %s82_s1, 128, %s84_s21, [#allocation4]  }
  0x4a   :  { %176 = dma.done.wait [#allocation4], 128  }
  0x4b   :  { %177 = vsyncadd [#allocation4], 4294967168 }
  0x4c   :  { %91 = vsyncpa [#allocation3], 1 }
  0x4d   :  { %92 = vsyncpa [#allocation6], 1 }
  0x4e   :  { %93 = vsyncpa [#allocation4], 1 }

</bundles_post_ra>
